<compile_context>
chip_gen: v5e
topology: v5e:2x2
jax: 0.10.0
libtpu: 0.0.40
codegen_flags: <defaults>
</compile_context>

<pallas_src>
import jax
import jax.numpy as jnp
from jax.experimental import pallas as pl
from jax.experimental.pallas import tpu as pltpu


# ----------------------------------------------------------------------------
# Fused kernels (single block, everything resident in VMEM)
# ----------------------------------------------------------------------------
def _hybrid_kernel(ids_ref,                  # [B, 1]   int32  CLS token ids
                   img_ref,                  # [B, CHW] bf16   flattened image
                   lut_ref,                  # [V, HID] bf16   folded text LUT
                   wv_ref,                   # [CHW,HID] bf16  folded vision weight
                   b1_ref,                   # [1, HID] f32    folded bias
                   w2_ref,                   # [HID,NCP] bf16  head layer 2 (padded)
                   b2_ref,                   # [1, NCP] f32
                   o_ref):                   # [B, NCP] f32    padded logits
    B = o_ref.shape[0]
    V = lut_ref.shape[0]

    # CLS-token "gather" as a one-hot MXU matmul (vectorized in B, no scratch).
    iota = jax.lax.broadcasted_iota(jnp.int32, (B, V), 1)
    onehot = (iota == ids_ref[...]).astype(jnp.bfloat16)            # [B, V]
    txt = jnp.dot(onehot, lut_ref[...],
                  preferred_element_type=jnp.float32)               # [B, HID]

    vis = jnp.dot(img_ref[...], wv_ref[...],
                  preferred_element_type=jnp.float32)               # [B, HID]

    # Bias add + ReLU in f32 on the MXU accumulator (no bf16 VPU work on v5e).
    h = jnp.maximum(vis + txt + b1_ref[...], 0.0)
    # TODO(synk): dropout(p=0.3) skipped — identity at inference.

    o_ref[...] = (jnp.dot(h.astype(jnp.bfloat16), w2_ref[...],
                          preferred_element_type=jnp.float32)
                  + b2_ref[...]).astype(o_ref.dtype)


def _text_only_kernel(ids_ref, lut_ref, b_ref, o_ref):
    B = o_ref.shape[0]
    V = lut_ref.shape[0]
    iota = jax.lax.broadcasted_iota(jnp.int32, (B, V), 1)
    onehot = (iota == ids_ref[...]).astype(jnp.bfloat16)
    o_ref[...] = (jnp.dot(onehot, lut_ref[...],
                          preferred_element_type=jnp.float32)
                  + b_ref[...]).astype(o_ref.dtype)


def _vision_only_kernel(img_ref, w_ref, b_ref, o_ref):
    o_ref[...] = (jnp.dot(img_ref[...], w_ref[...],
                          preferred_element_type=jnp.float32)
                  + b_ref[...]).astype(o_ref.dtype)


# ----------------------------------------------------------------------------
# pallas_call wrappers
# ----------------------------------------------------------------------------
def _full_spec(shape):
    nd = len(shape)
    return pl.BlockSpec(shape, lambda i, _nd=nd: (0,) * _nd)


_PARALLEL = pltpu.CompilerParams(dimension_semantics=("parallel",))


def hybrid_forward(params, text_ids, image):
    B = image.shape[0]
    img = image.reshape(B, -1).astype(jnp.bfloat16)     # NCHW row-major flatten
    cls_ids = text_ids[:, :1].astype(jnp.int32)         # only the CLS column is read
    V, HID = params["hyb_lut"].shape
    CHW = params["hyb_wv"].shape[0]
    NCP = params["hyb_b2"].shape[1]

    out = pl.pallas_call(
        _hybrid_kernel,
        out_shape=jax.ShapeDtypeStruct((B, NCP), jnp.float32),
        grid=(1,),
        in_specs=[
            _full_spec((B, 1)),        # CLS ids
            _full_spec((B, CHW)),      # image (bf16)
            _full_spec((V, HID)),      # folded text LUT (bf16)
            _full_spec((CHW, HID)),    # folded vision weight (bf16)
            _full_spec((1, HID)),      # folded bias (f32)
            _full_spec((HID, NCP)),    # head layer 2 (bf16, lane-padded)
            _full_spec((1, NCP)),      # head layer 2 bias (f32, lane-padded)
        ],
        out_specs=_full_spec((B, NCP)),
        compiler_params=_PARALLEL,
    )(cls_ids, img, params["hyb_lut"], params["hyb_wv"], params["hyb_b1"],
      params["hyb_w2"], params["hyb_b2"])
    return out[:, :params["num_classes"]]


def text_only_forward(params, text_ids):
    B = text_ids.shape[0]
    cls_ids = text_ids[:, :1].astype(jnp.int32)
    V, NCP = params["txt_lut"].shape

    out = pl.pallas_call(
        _text_only_kernel,
        out_shape=jax.ShapeDtypeStruct((B, NCP), jnp.float32),
        grid=(1,),
        in_specs=[_full_spec((B, 1)), _full_spec((V, NCP)), _full_spec((1, NCP))],
        out_specs=_full_spec((B, NCP)),
        compiler_params=_PARALLEL,
    )(cls_ids, params["txt_lut"], params["txt_b"])
    return out[:, :params["num_classes"]]


def vision_only_forward(params, image):
    B = image.shape[0]
    img = image.reshape(B, -1).astype(jnp.bfloat16)
    CHW, NCP = params["vis_w_fold"].shape

    out = pl.pallas_call(
        _vision_only_kernel,
        out_shape=jax.ShapeDtypeStruct((B, NCP), jnp.float32),
        grid=(1,),
        in_specs=[_full_spec((B, CHW)), _full_spec((CHW, NCP)), _full_spec((1, NCP))],
        out_specs=_full_spec((B, NCP)),
        compiler_params=_PARALLEL,
    )(img, params["vis_w_fold"], params["vis_b_fold"])
    return out[:, :params["num_classes"]]


# ----------------------------------------------------------------------------
# Parameters (raw weights + exact f32 offline folding, then bf16 cast)
# ----------------------------------------------------------------------------
def make_params(key, *, vocab=64, c=4, h=16, w=16, d_text=32, d_vis=32,
                hidden_dim=128, num_classes=10, padded_classes=128):
    ks = jax.random.split(key, 11)
    s = 0.02
    f32, bf16 = jnp.float32, jnp.bfloat16
    chw = c * h * w

    raw = {
        "embed": s * jax.random.normal(ks[0], (vocab, d_text), f32),
        "text_w": s * jax.random.normal(ks[1], (d_text, d_text), f32),
        "text_b": 0.01 * jax.random.normal(ks[2], (d_text,), f32),
        "vis_w": s * jax.random.normal(ks[3], (chw, d_vis), f32),
        "vis_b": 0.01 * jax.random.normal(ks[4], (d_vis,), f32),
        "text_head_w": s * jax.random.normal(ks[5], (d_text, num_classes), f32),
        "text_head_b": 0.01 * jax.random.normal(ks[6], (num_classes,), f32),
        "vis_head_w": s * jax.random.normal(ks[7], (d_vis, num_classes), f32),
        "vis_head_b": 0.01 * jax.random.normal(ks[8], (num_classes,), f32),
        "hyb_w1": s * jax.random.normal(ks[9], (d_vis + d_text, hidden_dim), f32),
        "hyb_b1": jnp.zeros((hidden_dim,), f32),
        "hyb_w2": s * jax.random.normal(ks[10], (hidden_dim, num_classes), f32),
        "hyb_b2": jnp.zeros((num_classes,), f32),
    }

    def pad_cols(x, n):
        return jnp.pad(x, ((0, 0), (0, n - x.shape[1])))

    # Exact f32 folding of the affine pre-ReLU path.
    w1_vis = raw["hyb_w1"][:d_vis]                       # torch.cat order: [vision, text]
    w1_txt = raw["hyb_w1"][d_vis:]
    txt_feat = raw["embed"] @ raw["text_w"] + raw["text_b"]          # [V, d_text]

    params = {
        # hybrid path
        "hyb_lut": (txt_feat @ w1_txt).astype(bf16),                  # [V, HID]
        "hyb_wv": (raw["vis_w"] @ w1_vis).astype(bf16),               # [CHW, HID]
        "hyb_b1": (raw["vis_b"] @ w1_vis + raw["hyb_b1"])[None, :],   # [1, HID] f32
        "hyb_w2": pad_cols(raw["hyb_w2"], padded_classes).astype(bf16),
        "hyb_b2": pad_cols(raw["hyb_b2"][None, :], padded_classes),
        # text-only path (logits LUT, lane-padded)
        "txt_lut": pad_cols(txt_feat @ raw["text_head_w"], padded_classes).astype(bf16),
        "txt_b": pad_cols(raw["text_head_b"][None, :], padded_classes),
        # vision-only path (folded, lane-padded)
        "vis_w_fold": pad_cols(raw["vis_w"] @ raw["vis_head_w"], padded_classes).astype(bf16),
        "vis_b_fold": pad_cols((raw["vis_b"] @ raw["vis_head_w"]
                                + raw["vis_head_b"])[None, :], padded_classes),
        "num_classes": num_classes,
    }
    return params, raw


# ----------------------------------------------------------------------------
# Model-level dispatch (mirrors HybridModel.forward)
# ----------------------------------------------------------------------------
def hybrid_model_forward(params, text, image):
    """The PyTorch sentinel (rank-1 tensor with first element -1) is detected
    from the STATIC rank / None only, so no device->host sync is issued."""
    # TODO(synk): the value==-1 part of the sentinel check is not read back to
    # host; a rank-1 array (or None) is treated as an absent modality.
    has_text = text is not None and text.ndim > 1
    has_image = image is not None and image.ndim > 1

    if has_text and not has_image:
        return text_only_forward(params, text)
    if has_image and not has_text:
        return vision_only_forward(params, image)
    if has_text and has_image:
        return hybrid_forward(params, text, image)
    raise ValueError("At least one of text / image must be present.")


# ----------------------------------------------------------------------------
# Pure-JAX reference (unfolded f32 weights) for a loose numerics check
# ----------------------------------------------------------------------------
def _ref_hybrid(raw, text, image):
    txt = raw["embed"][text] @ raw["text_w"] + raw["text_b"]        # [B,S,d_text]
    txt_cls = txt[:, 0]
    vis = image.reshape(image.shape[0], -1) @ raw["vis_w"] + raw["vis_b"]
    emb = jnp.concatenate([vis, txt_cls], axis=1)
    h = jnp.maximum(emb @ raw["hyb_w1"] + raw["hyb_b1"], 0.0)
    return h @ raw["hyb_w2"] + raw["hyb_b2"]


def _ref_text_only(raw, text):
    txt_cls = (raw["embed"][text] @ raw["text_w"] + raw["text_b"])[:, 0]
    return txt_cls @ raw["text_head_w"] + raw["text_head_b"]


def _ref_vision_only(raw, image):
    vis = image.reshape(image.shape[0], -1) @ raw["vis_w"] + raw["vis_b"]
    return vis @ raw["vis_head_w"] + raw["vis_head_b"]


# ----------------------------------------------------------------------------
if __name__ == "__main__":
    key = jax.random.PRNGKey(0)
    k_params, k_text, k_img = jax.random.split(key, 3)

    B, C, H, W = 2, 4, 16, 16
    S, VOCAB = 8, 64
    NUM_CLASSES = 10

    params, raw = make_params(k_params, vocab=VOCAB, c=C, h=H, w=W,
                              d_text=32, d_vis=32, hidden_dim=128,
                              num_classes=NUM_CLASSES)

    text = jax.random.randint(k_text, (B, S), 0, VOCAB, dtype=jnp.int32)
    image = jax.random.normal(k_img, (B, C, H, W), jnp.float32)   # NCHW

    # Hybrid path (both modalities): single fused pallas_call.
    logits = hybrid_model_forward(params, text, image)
    jax.block_until_ready(logits)
    assert logits.shape == (B, NUM_CLASSES), logits.shape

    # Single-modality branches (sentinel = rank-1 tensor, as in the reference).
    sentinel = jnp.array([-1], dtype=jnp.int32)
    text_only = hybrid_model_forward(params, text, sentinel)
    img_only = hybrid_model_forward(params, sentinel, image)
    jax.block_until_ready((text_only, img_only))
    assert text_only.shape == (B, NUM_CLASSES)
    assert img_only.shape == (B, NUM_CLASSES)

    # Loose numeric check vs. unfolded f32 reference (bf16 weights/activations).
    err_h = float(jnp.max(jnp.abs(logits - _ref_hybrid(raw, text, image))))
    err_t = float(jnp.max(jnp.abs(text_only - _ref_text_only(raw, text))))
    err_v = float(jnp.max(jnp.abs(img_only - _ref_vision_only(raw, image))))
    assert err_h < 5e-3, f"hybrid mismatch {err_h}"
    assert err_t < 5e-3, f"text-only mismatch {err_t}"
    assert err_v < 5e-3, f"vision-only mismatch {err_v}"

    print("KERNEL_OK")
</pallas_src>

<mosaic_0001>
module attributes {stable_mosaic.version = 11 : i64} {
  func.func @_hybrid_kernel(%arg0: i32, %arg1: memref<2x1xi32, #tpu.memory_space<vmem>>, %arg2: memref<2x1024xbf16, #tpu.memory_space<vmem>>, %arg3: memref<64x128xbf16, #tpu.memory_space<vmem>>, %arg4: memref<1024x128xbf16, #tpu.memory_space<vmem>>, %arg5: memref<1x128xf32, #tpu.memory_space<vmem>>, %arg6: memref<128x128xbf16, #tpu.memory_space<vmem>>, %arg7: memref<1x128xf32, #tpu.memory_space<vmem>>, %arg8: memref<2x128xf32, #tpu.memory_space<vmem>>) attributes {dimension_semantics = [#tpu.dimension_semantics<parallel>], iteration_bounds = array<i64: 1>, scalar_prefetch = 0 : i64, scratch_operands = 0 : i64, tpu.core_type = #tpu.core_type<tc>, window_params = [{pipeline_mode = #tpu.pipeline_mode<synchronous>, transform_indices = @transform_0, window_bounds = array<i64: 2, 1>}, {pipeline_mode = #tpu.pipeline_mode<synchronous>, transform_indices = @transform_1, window_bounds = array<i64: 2, 1024>}, {pipeline_mode = #tpu.pipeline_mode<synchronous>, transform_indices = @transform_2, window_bounds = array<i64: 64, 128>}, {pipeline_mode = #tpu.pipeline_mode<synchronous>, transform_indices = @transform_3, window_bounds = array<i64: 1024, 128>}, {pipeline_mode = #tpu.pipeline_mode<synchronous>, transform_indices = @transform_4, window_bounds = array<i64: 1, 128>}, {pipeline_mode = #tpu.pipeline_mode<synchronous>, transform_indices = @transform_5, window_bounds = array<i64: 128, 128>}, {pipeline_mode = #tpu.pipeline_mode<synchronous>, transform_indices = @transform_6, window_bounds = array<i64: 1, 128>}, {pipeline_mode = #tpu.pipeline_mode<synchronous>, transform_indices = @transform_7, window_bounds = array<i64: 2, 128>}]} {
    %0 = tpu.iota {dimensions = array<i32: 1>} : vector<2x64xi32>
    %c0 = arith.constant 0 : index
    %c0_0 = arith.constant 0 : index
    %1 = vector.load %arg1[%c0, %c0_0] : memref<2x1xi32, #tpu.memory_space<vmem>>, vector<2x1xi32>
    %2 = vector.broadcast %1 : vector<2x1xi32> to vector<2x64xi32>
    %3 = arith.cmpi eq, %0, %2 : vector<2x64xi32>
    %4 = arith.extui %3 : vector<2x64xi1> to vector<2x64xi32>
    %5 = arith.sitofp %4 : vector<2x64xi32> to vector<2x64xf32>
    %6 = arith.truncf %5 : vector<2x64xf32> to vector<2x64xbf16>
    %c0_1 = arith.constant 0 : index
    %c0_2 = arith.constant 0 : index
    %7 = vector.load %arg3[%c0_1, %c0_2] : memref<64x128xbf16, #tpu.memory_space<vmem>>, vector<64x128xbf16>
    %cst = arith.constant dense<0.000000e+00> : vector<2x128xf32>
    %8 = tpu.matmul %6, %7, %cst {dimension_numbers = #tpu.dot_dimension_numbers<[1], [0], [0], [1], [0, 0, 1, 1], [], []>} : vector<2x64xbf16>, vector<64x128xbf16>, vector<2x128xf32> -> vector<2x128xf32>
    %c0_3 = arith.constant 0 : index
    %c0_4 = arith.constant 0 : index
    %9 = vector.load %arg2[%c0_3, %c0_4] : memref<2x1024xbf16, #tpu.memory_space<vmem>>, vector<2x1024xbf16>
    %c0_5 = arith.constant 0 : index
    %c0_6 = arith.constant 0 : index
    %10 = vector.load %arg4[%c0_5, %c0_6] : memref<1024x128xbf16, #tpu.memory_space<vmem>>, vector<1024x128xbf16>
    %cst_7 = arith.constant dense<0.000000e+00> : vector<2x128xf32>
    %11 = tpu.matmul %9, %10, %cst_7 {dimension_numbers = #tpu.dot_dimension_numbers<[1], [0], [0], [1], [0, 0, 1, 1], [], []>} : vector<2x1024xbf16>, vector<1024x128xbf16>, vector<2x128xf32> -> vector<2x128xf32>
    %12 = arith.addf %11, %8 : vector<2x128xf32>
    %c0_8 = arith.constant 0 : index
    %c0_9 = arith.constant 0 : index
    %13 = vector.load %arg5[%c0_8, %c0_9] : memref<1x128xf32, #tpu.memory_space<vmem>>, vector<1x128xf32>
    %14 = vector.broadcast %13 : vector<1x128xf32> to vector<2x128xf32>
    %15 = arith.addf %12, %14 : vector<2x128xf32>
    %cst_10 = arith.constant 0.000000e+00 : f32
    %16 = vector.broadcast %cst_10 : f32 to vector<2x128xf32>
    %17 = arith.maximumf %15, %16 : vector<2x128xf32>
    %18 = arith.truncf %17 : vector<2x128xf32> to vector<2x128xbf16>
    %c0_11 = arith.constant 0 : index
    %c0_12 = arith.constant 0 : index
    %19 = vector.load %arg6[%c0_11, %c0_12] : memref<128x128xbf16, #tpu.memory_space<vmem>>, vector<128x128xbf16>
    %cst_13 = arith.constant dense<0.000000e+00> : vector<2x128xf32>
    %20 = tpu.matmul %18, %19, %cst_13 {dimension_numbers = #tpu.dot_dimension_numbers<[1], [0], [0], [1], [0, 0, 1, 1], [], []>} : vector<2x128xbf16>, vector<128x128xbf16>, vector<2x128xf32> -> vector<2x128xf32>
    %c0_14 = arith.constant 0 : index
    %c0_15 = arith.constant 0 : index
    %21 = vector.load %arg7[%c0_14, %c0_15] : memref<1x128xf32, #tpu.memory_space<vmem>>, vector<1x128xf32>
    %22 = vector.broadcast %21 : vector<1x128xf32> to vector<2x128xf32>
    %23 = arith.addf %20, %22 : vector<2x128xf32>
    %c0_16 = arith.constant 0 : index
    %c0_17 = arith.constant 0 : index
    %24 = vector.load %arg8[%c0_16, %c0_17] : memref<2x128xf32, #tpu.memory_space<vmem>>, vector<2x128xf32>
    tpu.vector_store %arg8[%c0_16, %c0_17], %23 {strides = array<i32>} : memref<2x128xf32, #tpu.memory_space<vmem>>, vector<2x128xf32>,
    return
  }
  func.func @transform_0(%arg0: i32) -> (i32, i32) {
    %c0_i32 = arith.constant 0 : i32
    %c0_i32_0 = arith.constant 0 : i32
    %c0_i32_1 = arith.constant 0 : i32
    return %c0_i32, %c0_i32_0 : i32, i32
  }
  func.func @transform_1(%arg0: i32) -> (i32, i32) {
    %c0_i32 = arith.constant 0 : i32
    %c0_i32_0 = arith.constant 0 : i32
    %c0_i32_1 = arith.constant 0 : i32
    return %c0_i32, %c0_i32_0 : i32, i32
  }
  func.func @transform_2(%arg0: i32) -> (i32, i32) {
    %c0_i32 = arith.constant 0 : i32
    %c0_i32_0 = arith.constant 0 : i32
    %c0_i32_1 = arith.constant 0 : i32
    return %c0_i32, %c0_i32_0 : i32, i32
  }
  func.func @transform_3(%arg0: i32) -> (i32, i32) {
    %c0_i32 = arith.constant 0 : i32
    %c0_i32_0 = arith.constant 0 : i32
    %c0_i32_1 = arith.constant 0 : i32
    return %c0_i32, %c0_i32_0 : i32, i32
  }
  func.func @transform_4(%arg0: i32) -> (i32, i32) {
    %c0_i32 = arith.constant 0 : i32
    %c0_i32_0 = arith.constant 0 : i32
    %c0_i32_1 = arith.constant 0 : i32
    return %c0_i32, %c0_i32_0 : i32, i32
  }
  func.func @transform_5(%arg0: i32) -> (i32, i32) {
    %c0_i32 = arith.constant 0 : i32
    %c0_i32_0 = arith.constant 0 : i32
    %c0_i32_1 = arith.constant 0 : i32
    return %c0_i32, %c0_i32_0 : i32, i32
  }
  func.func @transform_6(%arg0: i32) -> (i32, i32) {
    %c0_i32 = arith.constant 0 : i32
    %c0_i32_0 = arith.constant 0 : i32
    %c0_i32_1 = arith.constant 0 : i32
    return %c0_i32, %c0_i32_0 : i32, i32
  }
  func.func @transform_7(%arg0: i32) -> (i32, i32) {
    %c0_i32 = arith.constant 0 : i32
    %c0_i32_0 = arith.constant 0 : i32
    %c0_i32_1 = arith.constant 0 : i32
    return %c0_i32, %c0_i32_0 : i32, i32
  }
}

</mosaic_0001>

<bundles_post_ra>
// kernel: tpu_custom_call.1
= control target key start
LH: loop header
LB: loop body
LE: loop exit
PB: predicated region body
PF: predicated region fallthrough
CT: control target
= control target key end

     0   :  { %12 = vsyncpa [#allocation3], 0  ;;  %s1486_s0 = inlined_call_operand.vmem [shape: s32[2,1], index: 0, kind: input, shape index: {}]   ;;  %s1487_s1 = inlined_call_operand.hbm [shape: bf16[2,1024], index: 1, kind: input, shape index: {}]   ;;  %s1488_s2 = inlined_call_operand.hbm [shape: bf16[64,128], index: 2, kind: input, shape index: {}]   ;;  %s1489_s3 = inlined_call_operand.hbm [shape: bf16[1024,128], index: 3, kind: input, shape index: {}]   ;;  %s1490_s4 = inlined_call_operand.vmem [shape: f32[1,128], index: 4, kind: input, shape index: {}]   ;;  %s1491_s5 = inlined_call_operand.hbm [shape: bf16[128,128], index: 5, kind: input, shape index: {}]   ;;  %s1492_s6 = inlined_call_operand.vmem [shape: f32[1,128], index: 6, kind: input, shape index: {}]   ;;  %s1493_s7 = inlined_call_operand.hbm [shape: f32[2,128], index: 7, kind: output, shape index: {}]  }
   0x1   :  { %13 = vsyncpa [#allocation6], 0 }
   0x2   :  { %14 = vsyncpa [#allocation9], 0  ;;  %s33_s26 = sshll.u32 %s1488_s2, 4  ;;  %s34_s26 = int_to_ptr.hbm [resolvable:$true] %s33_s26 }
   0x3   :  { %15 = vsyncpa [#allocation4], 0  ;;  %s1413_s27 = smov [#allocation5]   ;;  %s23_s8 = sshll.u32 %s1487_s1, 4  ;;  %s24_s8 = int_to_ptr.hbm [resolvable:$true] %s23_s8 }
   0x4   :  { %s35_s28 = sshll.u32 %s1413_s27, 4  ;;  %s1414_s9 = smov 64   ;;  %s36_s28 = int_to_ptr.vmem [resolvable:$true] %s35_s28 }
   0x5   :  { %s1415_s10 = smov 4   ;;  %s1416_s11 = smov [#allocation2]  }
   0x6   :  { %41 = dma.hbm_to_vmem [thread:$0]  %s34_s26, 512, %s36_s28, [#allocation6], %s1414_s9, %s1414_s9, %s1415_s10  }
   0x7   :  { %s25_s12 = sshll.u32 %s1416_s11, 4  ;;  %s46_s15 = sshll.u32 %s1489_s3, 4  ;;  %s26_s12 = int_to_ptr.vmem [resolvable:$true] %s25_s12  ;;  %s47_s15 = int_to_ptr.hbm [resolvable:$true] %s46_s15 }
   0x8   :  { %28 = dma.hbm_to_vmem [thread:$0]  %s24_s8, 128, %s26_s12, [#allocation3]  }
   0x9   :  { %s61_s17 = sshll.u32 %s1491_s5, 4  ;;  %s1417_s18 = smov [#allocation7]   ;;  %s62_s17 = int_to_ptr.hbm [resolvable:$true] %s61_s17 }
   0xa   :  { %s48_s19 = sshll.u32 %s1417_s18, 4  ;;  %s1418_s1 = smov [#allocation8]   ;;  %s49_s19 = int_to_ptr.vmem [resolvable:$true] %s48_s19 }
   0xb   :  { %54 = dma.hbm_to_vmem [thread:$0]  %s47_s15, 8192, %s49_s19, [#allocation6], %s1414_s9, %s1414_s9, %s1415_s10  }
   0xc   :  { %s63_s20 = sshll.u32 %s1418_s1, 4  ;;  %s64_s20 = int_to_ptr.vmem [resolvable:$true] %s63_s20 }
   0xd   :  { %69 = dma.hbm_to_vmem [thread:$0]  %s62_s17, 1024, %s64_s20, [#allocation9], %s1414_s9, %s1414_s9, %s1415_s10  }
   0xe   :  { %1405 = dma.done.wait [#allocation3], 128  }
   0xf   :  { %1406 = vsyncadd [#allocation3], 4294967168 }
  0x10   :  { %1407 = dma.done.wait [#allocation6], 8704  }
  0x11   :  { %1408 = vsyncadd [#allocation6], 4294958592 }
  0x12   :  { %1409 = dma.done.wait [#allocation9], 1024  }
  0x13   :  { %1410 = vsyncadd [#allocation9], 4294966272  ;;  %v1419_v0 = vmov 0   ;;  %v91_v1 = vld [vmem:[%s1486_s0] sm:$0x3]  ;;  %v1216_v2 = vld [vmem:[#allocation7 + $0x78] sm:$0xff] }
  0x14   :  { %1282 = vset.pattern.permute.xlu0 %v1419_v0  ;;  %v1224_v3 = vld [vmem:[#allocation7 + $0xb8] sm:$0xff]  ;;  %692 = vmatpush.bf16.msra.mxu2 %v1216_v2  ;;  %v1215_v6 = vld [vmem:[#allocation7 + $0x70] sm:$0xff]  ;;  %v1214_v10 = vld [vmem:[#allocation7 + $0x68] sm:$0xff]  ;;  %vm131_vm1 = vcmask 523264   ;;  %s1421_s24 = smov [#allocation10]   ;;  %s879_s28 = sshll.u32 %s1493_s7, 4  ;;  %s880_s28 = int_to_ptr.hbm [resolvable:$true] %s879_s28 }
  0x15   :  { %93 = vperm.xlu0 %1282, %v91_v1   ;;  %v1208_v4 = vld [vmem:[#allocation7 + $0x38] sm:$0xff]  ;;  %705 = vmatpush.bf16.msra.mxu3 %v1224_v3  ;;  %v1223_v7 = vld [vmem:[#allocation7 + $0xb0] sm:$0xff]  ;;  %v1222_v11 = vld [vmem:[#allocation7 + $0xa8] sm:$0xff]  ;;  %s877_s25 = sshll.u32 %s1421_s24, 4  ;;  %s878_s25 = int_to_ptr.vmem [resolvable:$true] %s877_s25 }
  0x16   :  { %v1200_v5 = vld [vmem:[#allocation5 + $0x18] sm:$0xff]  ;;  %679 = vmatpush.bf16.msra.mxu1 %v1208_v4  ;;  %v1207_v8 = vld [vmem:[#allocation7 + $0x30] sm:$0xff]  ;;  %v1206_v12 = vld [vmem:[#allocation7 + $0x28] sm:$0xff] }
  0x17   :  { %139 = vmatpush.bf16.msra.mxu0 %v1200_v5  ;;  %v1199_v9 = vld [vmem:[#allocation5 + $0x10] sm:$0xff]  ;;  %v1198_v13 = vld [vmem:[#allocation5 + $0x8] sm:$0xff]  ;;  %v1213_v14 = vld [vmem:[#allocation7 + $0x60] sm:$0xff]  ;;  %v89_v5 = vlaneseq }
  0x18   :  { %693 = vmatpush.bf16.msra.mxu2 %v1215_v6  ;;  %v1221_v15 = vld [vmem:[#allocation7 + $0xa0] sm:$0xff]  ;;  %v1232_v18 = vld [vmem:[#allocation7 + $0xf8] sm:$0xff]  ;;  %v1231_v22 = vld [vmem:[#allocation7 + $0xf0] sm:$0xff] }
  0x19   :  { %706 = vmatpush.bf16.msra.mxu3 %v1223_v7  ;;  %v1205_v16 = vld [vmem:[#allocation7 + $0x20] sm:$0xff]  ;;  %v1212_v19 = vld [vmem:[#allocation7 + $0x58] sm:$0xff]  ;;  %v1211_v23 = vld [vmem:[#allocation7 + $0x50] sm:$0xff]  ;;  %v90_v6 = vand.u32 127, %v89_v5 }
  0x1a   :  { %680 = vmatpush.bf16.msra.mxu1 %v1207_v8  ;;  %v1197_v17 = vld [vmem:[#allocation5] sm:$0xff]  ;;  %v1220_v20 = vld [vmem:[#allocation7 + $0x98] sm:$0xff]  ;;  %v1219_v24 = vld [vmem:[#allocation7 + $0x90] sm:$0xff]  ;;  %v1420_v8 = vmov 0.0  }
  0x1b   :  { %140 = vmatpush.bf16.msra.mxu0 %v1199_v9  ;;  %v1204_v21 = vld [vmem:[#allocation7 + $0x18] sm:$0xff]  ;;  %v1203_v25 = vld [vmem:[#allocation7 + $0x10] sm:$0xff]  ;;  %v1230_v26 = vld [vmem:[#allocation7 + $0xe8] sm:$0xff] }
  0x1c   :  { %694 = vmatpush.bf16.msra.mxu2 %v1214_v10  ;;  %v1210_v27 = vld [vmem:[#allocation7 + $0x48] sm:$0xff]  ;;  %v1229_v30 = vld [vmem:[#allocation7 + $0xe0] sm:$0xff]  ;;  %v1248_v33 = vld [vmem:[#allocation7 + $0x178] sm:$0xff] }
  0x1d   :  { %707 = vmatpush.bf16.msra.mxu3 %v1222_v11  ;;  %v1218_v28 = vld [vmem:[#allocation7 + $0x88] sm:$0xff]  ;;  %v1209_v31 = vld [vmem:[#allocation7 + $0x40] sm:$0xff]  ;;  %v1256_v34 = vld [vmem:[#allocation7 + $0x1b8] sm:$0xff] }
  0x1e   :  { %681 = vmatpush.bf16.msra.mxu1 %v1206_v12  ;;  %v1202_v29 = vld [vmem:[#allocation7 + $0x8] sm:$0xff]  ;;  %v1217_v32 = vld [vmem:[#allocation7 + $0x80] sm:$0xff]  ;;  %v1228_v36 = vld [vmem:[#allocation7 + $0xd8] sm:$0xff] }
  0x1f   :  { %141 = vmatpush.bf16.msra.mxu0 %v1198_v13  ;;  %v1201_v35 = vld [vmem:[#allocation7] sm:$0xff]  ;;  %v1240_v37 = vld [vmem:[#allocation7 + $0x138] sm:$0xff]  ;;  %v1247_v38 = vld [vmem:[#allocation7 + $0x170] sm:$0xff] }
  0x20   :  { %695 = vmatpush.bf16.msra.mxu2 %v1213_v14  ;;  %v1255_v39 = vld [vmem:[#allocation7 + $0x1b0] sm:$0xff]  ;;  %v1246_v42 = vld [vmem:[#allocation7 + $0x168] sm:$0xff]  ;;  %v1245_v45 = vld [vmem:[#allocation7 + $0x160] sm:$0xff] }
  0x21   :  { %708 = vmatpush.bf16.msra.mxu3 %v1221_v15  ;;  %v1227_v40 = vld [vmem:[#allocation7 + $0xd0] sm:$0xff]  ;;  %v1254_v43 = vld [vmem:[#allocation7 + $0x1a8] sm:$0xff]  ;;  %v148_v46 = vld [vmem:[#allocation2] sm:$0xff] }
  0x22   :  { %682 = vmatpush.bf16.msra.mxu1 %v1205_v16  ;;  %v1239_v41 = vld [vmem:[#allocation7 + $0x130] sm:$0xff]  ;;  %v1238_v44 = vld [vmem:[#allocation7 + $0x128] sm:$0xff]  ;;  %278 = vst [vmem:[#allocation1] ss:$9 sm:$0xff] %v148_v46  ;;  %v1253_v49 = vld [vmem:[#allocation7 + $0x1a0] sm:$0xff] }
  0x23   :  { %142 = vmatpush.bf16.msra.mxu0 %v1197_v17  ;;  %v1226_v47 = vld [vmem:[#allocation7 + $0xc8] sm:$0xff]  ;;  %v1237_v51 = vld [vmem:[#allocation7 + $0x120] sm:$0xff]  ;;  %v1244_v52 = vld [vmem:[#allocation7 + $0x158] sm:$0xff] }
  0x24   :  { %696 = vmatpush.bf16.msra.mxu2 %v1212_v19  ;;  %v1225_v53 = vld [vmem:[#allocation7 + $0xc0] sm:$0xff]  ;;  %v1252_v55 = vld [vmem:[#allocation7 + $0x198] sm:$0xff]  ;;  %v1243_v57 = vld [vmem:[#allocation7 + $0x150] sm:$0xff] }
  0x25   :  { %709 = vmatpush.bf16.msra.mxu3 %v1220_v20  ;;  %v1236_v56 = vld [vmem:[#allocation7 + $0x118] sm:$0xff]  ;;  %v1251_v58 = vld [vmem:[#allocation7 + $0x190] sm:$0xff]  ;;  %v1242_v60 = vld [vmem:[#allocation7 + $0x148] sm:$0xff] }
  0x26   :  { %683 = vmatpush.bf16.msra.mxu1 %v1204_v21  ;;  %v1235_v59 = vld [vmem:[#allocation7 + $0x110] sm:$0xff]  ;;  %v1250_v61 = vld [vmem:[#allocation7 + $0x188] sm:$0xff]  ;;  %v1241_v63 = vld [vmem:[#allocation7 + $0x140] sm:$0xff] }
  0x27   :  { %718 = vmatpush.bf16.msrb.mxu0 %v1232_v18  ;;  %v1234_v62 = vld [vmem:[#allocation7 + $0x108] sm:$0xff]  ;;  %v1249_v0 = vld [vmem:[#allocation7 + $0x180] sm:$0xff]  ;;  %v1264_v10 = vld [vmem:[#allocation7 + $0x1f8] sm:$0xff] }
  0x28   :  { %697 = vmatpush.bf16.msra.mxu2 %v1211_v23  ;;  %v1233_v2 = vld [vmem:[#allocation7 + $0x100] sm:$0xff]  ;;  %v1263_v12 = vld [vmem:[#allocation7 + $0x1f0] sm:$0xff]  ;;  %v1262_v13 = vld [vmem:[#allocation7 + $0x1e8] sm:$0xff] }
  0x29   :  { %710 = vmatpush.bf16.msra.mxu3 %v1219_v24  ;;  %v280_v48 = vld [vmem:[#allocation1 + $0x9] sm:$0xff]  ;;  %v281_v50 = vld [vmem:[#allocation1 + $0x12] sm:$0xff]  ;;  %v279_v54 = vld [vmem:[#allocation1] sm:$0xff] }
  0x2a   :  { %684 = vmatpush.bf16.msra.mxu1 %v1203_v25  ;;  %v284_v1 = vld [vmem:[#allocation1 + $0x2d] sm:$0xff]  ;;  %v285_v3 = vld [vmem:[#allocation1 + $0x36] sm:$0xff]  ;;  %v283_v4 = vld [vmem:[#allocation1 + $0x24] sm:$0xff] }
  0x2b   :  { %719 = vmatpush.bf16.msrb.mxu0 %v1231_v22  ;;  %v1261_v14 = vld [vmem:[#allocation7 + $0x1e0] sm:$0xff]  ;;  %v282_v15 = vld [vmem:[#allocation1 + $0x1b] sm:$0xff]  ;;  %v1260_v16 = vld [vmem:[#allocation7 + $0x1d8] sm:$0xff] }
  0x2c   :  { %698 = vmatpush.bf16.msra.mxu2 %v1210_v27  ;;  %v1259_v17 = vld [vmem:[#allocation7 + $0x1d0] sm:$0xff]  ;;  %v1258_v18 = vld [vmem:[#allocation7 + $0x1c8] sm:$0xff]  ;;  %v1257_v19 = vld [vmem:[#allocation7 + $0x1c0] sm:$0xff] }
  0x2d   :  { %711 = vmatpush.bf16.msra.mxu3 %v1218_v28  ;;  %v286_v20 = vld [vmem:[#allocation1 + $0x3f] sm:$0xff]  ;;  %v1272_v25 = vld [vmem:[#allocation8 + $0x38] sm:$0xff] }
  0x2e   :  { %685 = vmatpush.bf16.msra.mxu1 %v1202_v29  ;;  %v1271_v27 = vld [vmem:[#allocation8 + $0x30] sm:$0xff]  ;;  %v1270_v29 = vld [vmem:[#allocation8 + $0x28] sm:$0xff] }
  0x2f   :  { %720 = vmatpush.bf16.msrb.mxu0 %v1230_v26 }
  0x30   :  { %699 = vmatpush.bf16.msra.mxu2 %v1209_v31 }
  0x31   :  { %712 = vmatpush.bf16.msra.mxu3 %v1217_v32  ;;  %v1269_v32 = vld [vmem:[#allocation8 + $0x20] sm:$0xff] }
  0x32   :  { %686 = vmatpush.bf16.msra.mxu1 %v1201_v35 }
  0x33   :  { %721 = vmatpush.bf16.msrb.mxu0 %v1229_v30  ;;  %700 = vmatmul.bf16.vlgmr.msra.gmra.mxu2 %v280_v48 }
  0x34   :  { %744 = vmatpush.bf16.msrb.mxu2 %v1248_v33  ;;  %713 = vmatmul.bf16.vlgmr.msra.gmra.mxu3 %v281_v50 }
  0x35   :  { %757 = vmatpush.bf16.msrb.mxu3 %v1256_v34  ;;  %687 = vmatmul.bf16.vlgmr.msra.gmra.mxu1 %v279_v54  ;;  %v1268_v34 = vld [vmem:[#allocation8 + $0x18] sm:$0xff] }
  0x36   :  { %731 = vmatpush.bf16.msrb.mxu1 %v1240_v37 }
  0x37   :  { %722 = vmatpush.bf16.msrb.mxu0 %v1228_v36  ;;  %v1267_v36 = vld [vmem:[#allocation8 + $0x10] sm:$0xff] }
  0x38   :  { %745 = vmatpush.bf16.msrb.mxu2 %v1247_v38 }
  0x39   :  { %758 = vmatpush.bf16.msrb.mxu3 %v1255_v39 }
  0x3a   :  { %732 = vmatpush.bf16.msrb.mxu1 %v1239_v41  ;;  %v1265_v41 = vld [vmem:[#allocation8] sm:$0xff] }
  0x3b   :  { %723 = vmatpush.bf16.msrb.mxu0 %v1227_v40  ;;  %v1266_v40 = vld [vmem:[#allocation8 + $0x8] sm:$0xff] }
  0x3c   :  { %746 = vmatpush.bf16.msrb.mxu2 %v1246_v42 }
  0x3d   :  { %759 = vmatpush.bf16.msrb.mxu3 %v1254_v43 }
  0x3e   :  { %733 = vmatpush.bf16.msrb.mxu1 %v1238_v44 }
  0x3f   :  { %724 = vmatpush.bf16.msrb.mxu0 %v1226_v47 }
  0x40   :  { %747 = vmatpush.bf16.msrb.mxu2 %v1245_v45 }
  0x41   :  { %760 = vmatpush.bf16.msrb.mxu3 %v1253_v49 }
  0x42   :  { %734 = vmatpush.bf16.msrb.mxu1 %v1237_v51 }
  0x43   :  { %725 = vmatpush.bf16.msrb.mxu0 %v1225_v53 }
  0x44   :  { %748 = vmatpush.bf16.msrb.mxu2 %v1244_v52  ;;  %v1283_v52 = vld [vmem:[%s1490_s4] ss:$0 sm:$0xff] }
  0x45   :  { %761 = vmatpush.bf16.msrb.mxu3 %v1252_v55 }
  0x46   :  { %735 = vmatpush.bf16.msrb.mxu1 %v1236_v56 }
  0x48   :  { %749 = vmatpush.bf16.msrb.mxu2 %v1243_v57 }
  0x49   :  { %762 = vmatpush.bf16.msrb.mxu3 %v1251_v58 }
  0x4a   :  { %736 = vmatpush.bf16.msrb.mxu1 %v1235_v59  ;;  %v1284_v59 = vld [vmem:[%s1492_s6] ss:$0 sm:$0xff] }
  0x4c   :  { %750 = vmatpush.bf16.msrb.mxu2 %v1242_v60 }
  0x4d   :  { %763 = vmatpush.bf16.msrb.mxu3 %v1250_v61 }
  0x4e   :  { %737 = vmatpush.bf16.msrb.mxu1 %v1234_v62 }
  0x50   :  { %751 = vmatpush.bf16.msrb.mxu2 %v1241_v63 }
  0x51   :  { %764 = vmatpush.bf16.msrb.mxu3 %v1249_v0 }
  0x52   :  { %738 = vmatpush.bf16.msrb.mxu1 %v1233_v2 }
  0x53   :  { %752 = vmatmul.bf16.vlgmr.msrb.gmra.mxu2 %v284_v1 }
  0x54   :  { %765 = vmatmul.bf16.vlgmr.msrb.gmra.mxu3 %v285_v3 }
  0x55   :  { %739 = vmatmul.bf16.vlgmr.msrb.gmra.mxu1 %v283_v4 }
  0x56   :  { %858 = vmatpush.bf16.msra.mxu1 %v1272_v25 }
  0x5a   :  { %859 = vmatpush.bf16.msra.mxu1 %v1271_v27 }
  0x5e   :  { %860 = vmatpush.bf16.msra.mxu1 %v1270_v29 }
  0x62   :  { %861 = vmatpush.bf16.msra.mxu1 %v1269_v32 }
  0x66   :  { %862 = vmatpush.bf16.msra.mxu1 %v1268_v34 }
  0x6a   :  { %863 = vmatpush.bf16.msra.mxu1 %v1267_v36 }
  0x6e   :  { %864 = vmatpush.bf16.msra.mxu1 %v1266_v40 }
  0x72   :  { %865 = vmatpush.bf16.msra.mxu1 %v1265_v41 }
  0x87   :  { %v94_v7 = vpop.permute.xlu0 %93 }
  0x88   :  { %vm95_vm0 = vcmp.eq.s32.totalorder %v90_v6, %v94_v7 }
  0x89   :  { %v891_v9 = vsel %vm95_vm0, 1.0, %v1420_v8 }
  0x8a   :  { %v98_v11 = vpack.c.bf16 %v891_v9, %v891_v9 }
  0x8c   :  { %908 = vmatmul.msk.bf16.vlgmr.msra.gmra.mxu0 %vm131_vm1, %v98_v11 }
  0x8d   :  { %770 = vmatpush.bf16.msra.mxu0 %v1264_v10 }
  0x91   :  { %771 = vmatpush.bf16.msra.mxu0 %v1263_v12 }
  0x95   :  { %772 = vmatpush.bf16.msra.mxu0 %v1262_v13 }
  0x99   :  { %773 = vmatpush.bf16.msra.mxu0 %v1261_v14 }
  0x9c   :  { %726 = vmatmul.bf16.vlgmr.msrb.gmra.mxu0 %v282_v15 }
  0x9d   :  { %774 = vmatpush.bf16.msra.mxu0 %v1260_v16 }
  0xa1   :  { %775 = vmatpush.bf16.msra.mxu0 %v1259_v17 }
  0xa5   :  { %776 = vmatpush.bf16.msra.mxu0 %v1258_v18 }
  0xa9   :  { %777 = vmatpush.bf16.msra.mxu0 %v1257_v19 }
  0xac   :  { %778 = vmatmul.bf16.vlgmr.msra.gmra.mxu0 %v286_v20 }
  0xb2   :  { %v688_v21 = vpop.f32.mrf.mxu1 }
  0xb6   :  { %v701_v22 = vpop.f32.mrf.mxu2 }
  0xb7   :  { %v714_v23 = vpop.f32.mrf.mxu3 }
  0xba   :  { %v690_v24 = vpop.f32.mrf.mxu1 }
  0xbe   :  { %v703_v26 = vpop.f32.mrf.mxu2 }
  0xbf   :  { %v716_v28 = vpop.f32.mrf.mxu3 }
  0xd2   :  { %v740_v30 = vpop.f32.mrf.mxu1 }
  0xd6   :  { %v753_v31 = vpop.f32.mrf.mxu2 }
  0xd7   :  { %v766_v33 = vpop.f32.mrf.mxu3 }
  0xda   :  { %v742_v35 = vpop.f32.mrf.mxu1 }
  0xde   :  { %v755_v37 = vpop.f32.mrf.mxu2 }
  0xdf   :  { %v768_v38 = vpop.f32.mrf.mxu3 }
 0x109   :  { %v144_v39 = vpop.f32.mrf.mxu0 }
 0x10a   :  { %v689_v43 = vadd.f32 %v688_v21, %v144_v39 }
 0x10c   :  { %v702_v44 = vadd.f32 %v701_v22, %v689_v43 }
 0x10e   :  { %v715_v46 = vadd.f32 %v714_v23, %v702_v44 }
 0x111   :  { %v146_v42 = vpop.f32.mrf.mxu0 }
 0x119   :  { %v727_v45 = vpop.f32.mrf.mxu0 }
 0x11a   :  { %v728_v47 = vadd.f32 %v727_v45, %v715_v46 }
 0x11c   :  { %v741_v48 = vadd.f32 %v740_v30, %v728_v47 }
 0x11e   :  { %v754_v50 = vadd.f32 %v753_v31, %v741_v48 }
 0x120   :  { %v767_v51 = vadd.f32 %v766_v33, %v754_v50 }
 0x121   :  { %v729_v49 = vpop.f32.mrf.mxu0 }
 0x129   :  { %v779_v53 = vpop.f32.mrf.mxu0 }
 0x12a   :  { %v780_v54 = vadd.f32 %v779_v53, %v767_v51 }
 0x12c   :  { %v787_v55 = vadd.f32 %v1283_v52, %v780_v54 }
 0x12e   :  { %v788_v56 = vmax.f32 %v787_v55, 0.0 }
 0x130   :  { %v789_v57 = vpack.c.bf16 %v788_v56, %v788_v56 }
 0x131   :  { %v781_v58 = vpop.f32.mrf.mxu0 }
 0x132   :  { %866 = vmatmul.bf16.vlgmr.msra.gmra.mxu1 %v789_v57 }
 0x1af   :  { %v867_v60 = vpop.f32.mrf.mxu1 }
 0x1b0   :  { %v868_v61 = vadd.f32 %v1284_v59, %v867_v60 }
 0x1b2   :  { %871 = vst [vmem:[#allocation10] sm:$0x3] %v868_v61 }
 0x1b3   :  { %882 = dma.vmem_to_hbm [thread:$0]  %s878_s25, 32, %s880_s28, [#allocation4]  }
 0x1b7   :  { %v869_v62 = vpop.f32.mrf.mxu1 }
 0x1b8   :  { %1411 = dma.done.wait [#allocation4], 32  }
 0x1b9   :  { %1412 = vsyncadd [#allocation4], 4294967264 }
 0x1ba   :  { %887 = vsyncpa [#allocation3], 1 }
 0x1bb   :  { %888 = vsyncpa [#allocation6], 1 }
 0x1bc   :  { %889 = vsyncpa [#allocation9], 1 }
 0x1bd   :  { %890 = vsyncpa [#allocation4], 1 }

</bundles_post_ra>
